<compile_context>
chip_gen: v5e
topology: v5e:2x2
jax: 0.10.0
libtpu: 0.0.40
codegen_flags: <defaults>
</compile_context>

<pallas_src>
import functools

import jax
import jax.numpy as jnp
from jax.experimental import pallas as pl
from jax.experimental.pallas import tpu as pltpu


def make_divisible(v, divisor=8, min_value=None, round_limit=0.9):
    min_value = min_value or divisor
    new_v = max(min_value, int(v + divisor / 2) // divisor * divisor)
    if new_v < round_limit * v:
        new_v += divisor
    return new_v


def _se_kernel(x_ref, w1t_ref, b1_ref, w2t_ref, b2_ref, o_ref, *, inv_hw):
    # x_ref:   (Nb, C, HWp)    w1t_ref: (C, RD)   b1_ref: (1, RD)
    # w2t_ref: (RD, C)         b2_ref:  (1, C)    o_ref:  (Nb, C, HWp)
    x = x_ref[...].astype(jnp.float32)                        # (Nb, C, HWp)
    # squeeze: global average pool (HW padding is zeros, divide by true HW)
    mean = jnp.sum(x, axis=-1) * inv_hw                       # (Nb, C)
    # fc1 (1x1 conv == batched matmul) + bias + ReLU
    s1 = jnp.dot(mean, w1t_ref[...],
                 preferred_element_type=jnp.float32) + b1_ref[...]    # (Nb, RD)
    s1 = jnp.maximum(s1, 0.0)
    # fc2 + bias + sigmoid gate
    s2 = jnp.dot(s1, w2t_ref[...],
                 preferred_element_type=jnp.float32) + b2_ref[...]    # (Nb, C)
    gate = jax.nn.sigmoid(s2)                                 # (Nb, C)
    # excite: broadcast-scale the resident input block
    o_ref[...] = (x * gate[:, :, None]).astype(o_ref.dtype)


def se_module(x, w1, b1, w2, b2, *, target_block_bytes=4 * 1024 * 1024):
    """SEModule forward. x: (N,C,H,W); w1:(RD,C) b1:(RD,) w2:(C,RD) b2:(C,)."""
    # TODO(synk): add_maxpool / norm_layer options are left at their defaults
    # (False / Identity), matching SEModule(channels) with default args.
    N, C, H, W = x.shape
    HW = H * W
    RD = w1.shape[0]

    # Pad HW up to a lane multiple so output stores are unmasked (zeros are
    # harmless: they do not change the sum and are sliced off afterwards).
    HWp = -(-HW // 128) * 128
    itemsize = jnp.dtype(x.dtype).itemsize
    per_image_bytes = C * HWp * itemsize

    # Images per block: ~target_block_bytes per buffer, but keep >= 2 grid
    # steps when N >= 2 so both TensorCores get work on megacore parts.
    Nb = max(1, target_block_bytes // per_image_bytes)
    Nb = max(1, min(Nb, -(-N // 2)))
    Npad = -(-N // Nb) * Nb

    xr = x.reshape(N, C, HW)
    if Npad != N or HWp != HW:
        xr = jnp.pad(xr, ((0, Npad - N), (0, 0), (0, HWp - HW)))

    # Pre-transpose weights so the FC stage is (Nb,C)@(C,RD) / (Nb,RD)@(RD,C).
    w1t = jnp.transpose(w1).astype(jnp.float32)               # (C, RD)
    w2t = jnp.transpose(w2).astype(jnp.float32)               # (RD, C)
    b1r = b1.reshape(1, RD).astype(jnp.float32)
    b2r = b2.reshape(1, C).astype(jnp.float32)

    kernel = functools.partial(_se_kernel, inv_hw=1.0 / HW)
    out = pl.pallas_call(
        kernel,
        out_shape=jax.ShapeDtypeStruct((Npad, C, HWp), x.dtype),
        grid_spec=pltpu.PrefetchScalarGridSpec(
            num_scalar_prefetch=0,
            grid=(Npad // Nb,),
            in_specs=[
                pl.BlockSpec((Nb, C, HWp), lambda n: (n, 0, 0)),
                pl.BlockSpec((C, RD), lambda n: (0, 0)),
                pl.BlockSpec((1, RD), lambda n: (0, 0)),
                pl.BlockSpec((RD, C), lambda n: (0, 0)),
                pl.BlockSpec((1, C), lambda n: (0, 0)),
            ],
            out_specs=pl.BlockSpec((Nb, C, HWp), lambda n: (n, 0, 0)),
        ),
        compiler_params=pltpu.CompilerParams(
            dimension_semantics=("parallel",),
            vmem_limit_bytes=48 * 1024 * 1024,
        ),
    )(xr, w1t, b1r, w2t, b2r)

    return out[:N, :, :HW].reshape(N, C, H, W)


def se_reference(x, w1, b1, w2, b2):
    # Pure-JAX reference mirroring the PyTorch forward (add_maxpool=False,
    # norm_layer=None, act=ReLU, gate=Sigmoid).
    mean = jnp.mean(x, axis=(2, 3))                           # (N, C)
    s = jnp.einsum("nc,rc->nr", mean, w1) + b1                # (N, RD)
    s = jnp.maximum(s, 0.0)
    s = jnp.einsum("nr,cr->nc", s, w2) + b2                   # (N, C)
    gate = jax.nn.sigmoid(s)[:, :, None, None]
    return x * gate


if __name__ == "__main__":
    N, C, H, W = 2, 32, 16, 16
    RD = make_divisible(C * (1.0 / 16), 8, round_limit=0.0)   # -> 8

    key = jax.random.PRNGKey(0)
    kx, kw1, kb1, kw2, kb2 = jax.random.split(key, 5)
    x = jax.random.normal(kx, (N, C, H, W), dtype=jnp.float32)
    # fc1: Conv2d(C, RD, 1) -> weight (RD, C), bias (RD,)
    w1 = jax.random.normal(kw1, (RD, C), dtype=jnp.float32) * 0.1
    b1 = jax.random.normal(kb1, (RD,), dtype=jnp.float32) * 0.1
    # fc2: Conv2d(RD, C, 1) -> weight (C, RD), bias (C,)
    w2 = jax.random.normal(kw2, (C, RD), dtype=jnp.float32) * 0.1
    b2 = jax.random.normal(kb2, (C,), dtype=jnp.float32) * 0.1

    out = se_module(x, w1, b1, w2, b2)
    out = jax.block_until_ready(out)

    ref = se_reference(x, w1, b1, w2, b2)
    assert out.shape == (N, C, H, W)
    assert jnp.allclose(out, ref, atol=1e-5, rtol=1e-5), "mismatch vs reference"
    print("KERNEL_OK")
</pallas_src>

<mosaic_0001>
module attributes {stable_mosaic.version = 11 : i64} {
  func.func @_se_kernel(%arg0: i32, %arg1: memref<1x32x256xf32, #tpu.memory_space<vmem>>, %arg2: memref<32x8xf32, #tpu.memory_space<vmem>>, %arg3: memref<1x8xf32, #tpu.memory_space<vmem>>, %arg4: memref<8x32xf32, #tpu.memory_space<vmem>>, %arg5: memref<1x32xf32, #tpu.memory_space<vmem>>, %arg6: memref<1x32x256xf32, #tpu.memory_space<vmem>>) attributes {dimension_semantics = [#tpu.dimension_semantics<parallel>], iteration_bounds = array<i64: 2>, scalar_prefetch = 0 : i64, scratch_operands = 0 : i64, tpu.core_type = #tpu.core_type<tc>, window_params = [{transform_indices = @transform_0, window_bounds = array<i64: 1, 32, 256>}, {pipeline_mode = #tpu.pipeline_mode<synchronous>, transform_indices = @transform_1, window_bounds = array<i64: 32, 8>}, {pipeline_mode = #tpu.pipeline_mode<synchronous>, transform_indices = @transform_2, window_bounds = array<i64: 1, 8>}, {pipeline_mode = #tpu.pipeline_mode<synchronous>, transform_indices = @transform_3, window_bounds = array<i64: 8, 32>}, {pipeline_mode = #tpu.pipeline_mode<synchronous>, transform_indices = @transform_4, window_bounds = array<i64: 1, 32>}, {transform_indices = @transform_5, window_bounds = array<i64: 1, 32, 256>}]} {
    %c0 = arith.constant 0 : index
    %c0_0 = arith.constant 0 : index
    %c0_1 = arith.constant 0 : index
    %0 = vector.load %arg1[%c0, %c0_0, %c0_1] : memref<1x32x256xf32, #tpu.memory_space<vmem>>, vector<1x32x256xf32>
    %cst = arith.constant dense<0.000000e+00> : vector<1x32xf32>
    %1 = vector.multi_reduction <add>, %0, %cst [2] : vector<1x32x256xf32> to vector<1x32xf32>
    %cst_2 = arith.constant 3.906250e-03 : f32
    %2 = vector.broadcast %cst_2 : f32 to vector<1x32xf32>
    %3 = arith.mulf %1, %2 : vector<1x32xf32>
    %c0_3 = arith.constant 0 : index
    %c0_4 = arith.constant 0 : index
    %4 = vector.load %arg2[%c0_3, %c0_4] : memref<32x8xf32, #tpu.memory_space<vmem>>, vector<32x8xf32>
    %cst_5 = arith.constant dense<0.000000e+00> : vector<1x8xf32>
    %5 = tpu.matmul %3, %4, %cst_5 {dimension_numbers = #tpu.dot_dimension_numbers<[1], [0], [0], [1], [0, 0, 1, 1], [], []>} : vector<1x32xf32>, vector<32x8xf32>, vector<1x8xf32> -> vector<1x8xf32>
    %c0_6 = arith.constant 0 : index
    %c0_7 = arith.constant 0 : index
    %6 = vector.load %arg3[%c0_6, %c0_7] : memref<1x8xf32, #tpu.memory_space<vmem>>, vector<1x8xf32>
    %7 = arith.addf %5, %6 : vector<1x8xf32>
    %cst_8 = arith.constant 0.000000e+00 : f32
    %8 = vector.broadcast %cst_8 : f32 to vector<1x8xf32>
    %9 = arith.maximumf %7, %8 : vector<1x8xf32>
    %c0_9 = arith.constant 0 : index
    %c0_10 = arith.constant 0 : index
    %10 = vector.load %arg4[%c0_9, %c0_10] : memref<8x32xf32, #tpu.memory_space<vmem>>, vector<8x32xf32>
    %cst_11 = arith.constant dense<0.000000e+00> : vector<1x32xf32>
    %11 = tpu.matmul %9, %10, %cst_11 {dimension_numbers = #tpu.dot_dimension_numbers<[1], [0], [0], [1], [0, 0, 1, 1], [], []>} : vector<1x8xf32>, vector<8x32xf32>, vector<1x32xf32> -> vector<1x32xf32>
    %c0_12 = arith.constant 0 : index
    %c0_13 = arith.constant 0 : index
    %12 = vector.load %arg5[%c0_12, %c0_13] : memref<1x32xf32, #tpu.memory_space<vmem>>, vector<1x32xf32>
    %13 = arith.addf %11, %12 : vector<1x32xf32>
    %14 = arith.negf %13 : vector<1x32xf32>
    %15 = math.exp %14 : vector<1x32xf32>
    %cst_14 = arith.constant 1.000000e+00 : f32
    %16 = vector.broadcast %cst_14 : f32 to vector<1x32xf32>
    %17 = arith.addf %16, %15 : vector<1x32xf32>
    %18 = arith.divf %16, %17 : vector<1x32xf32>
    %19 = vector.shape_cast %18 : vector<1x32xf32> to vector<1x32x1xf32>
    %20 = vector.broadcast %19 : vector<1x32x1xf32> to vector<1x32x256xf32>
    %21 = arith.mulf %0, %20 : vector<1x32x256xf32>
    %c0_15 = arith.constant 0 : index
    %c0_16 = arith.constant 0 : index
    %c0_17 = arith.constant 0 : index
    %22 = vector.load %arg6[%c0_15, %c0_16, %c0_17] : memref<1x32x256xf32, #tpu.memory_space<vmem>>, vector<1x32x256xf32>
    tpu.vector_store %arg6[%c0_15, %c0_16, %c0_17], %21 {strides = array<i32>} : memref<1x32x256xf32, #tpu.memory_space<vmem>>, vector<1x32x256xf32>,
    return
  }
  func.func @transform_0(%arg0: i32) -> (i32, i32, i32) {
    %c0_i32 = arith.constant 0 : i32
    %c0_i32_0 = arith.constant 0 : i32
    %c0_i32_1 = arith.constant 0 : i32
    return %arg0, %c0_i32, %c0_i32_0 : i32, i32, i32
  }
  func.func @transform_1(%arg0: i32) -> (i32, i32) {
    %c0_i32 = arith.constant 0 : i32
    %c0_i32_0 = arith.constant 0 : i32
    %c0_i32_1 = arith.constant 0 : i32
    return %c0_i32, %c0_i32_0 : i32, i32
  }
  func.func @transform_2(%arg0: i32) -> (i32, i32) {
    %c0_i32 = arith.constant 0 : i32
    %c0_i32_0 = arith.constant 0 : i32
    %c0_i32_1 = arith.constant 0 : i32
    return %c0_i32, %c0_i32_0 : i32, i32
  }
  func.func @transform_3(%arg0: i32) -> (i32, i32) {
    %c0_i32 = arith.constant 0 : i32
    %c0_i32_0 = arith.constant 0 : i32
    %c0_i32_1 = arith.constant 0 : i32
    return %c0_i32, %c0_i32_0 : i32, i32
  }
  func.func @transform_4(%arg0: i32) -> (i32, i32) {
    %c0_i32 = arith.constant 0 : i32
    %c0_i32_0 = arith.constant 0 : i32
    %c0_i32_1 = arith.constant 0 : i32
    return %c0_i32, %c0_i32_0 : i32, i32
  }
  func.func @transform_5(%arg0: i32) -> (i32, i32, i32) {
    %c0_i32 = arith.constant 0 : i32
    %c0_i32_0 = arith.constant 0 : i32
    %c0_i32_1 = arith.constant 0 : i32
    return %arg0, %c0_i32, %c0_i32_0 : i32, i32, i32
  }
}

</mosaic_0001>

<bundles_post_ra>
// kernel: tpu_custom_call.1
= control target key start
LH: loop header
LB: loop body
LE: loop exit
PB: predicated region body
PF: predicated region fallthrough
CT: control target
= control target key end

     0   :  { %10 = vsyncpa [#allocation3], 0  ;;  %s886_s0 = inlined_call_operand.hbm [shape: f32[2,32,256], index: 0, kind: input, shape index: {}]   ;;  %s887_s1 = inlined_call_operand.vmem [shape: f32[32,8], index: 1, kind: input, shape index: {}]   ;;  %s888_s2 = inlined_call_operand.vmem [shape: f32[1,8], index: 2, kind: input, shape index: {}]   ;;  %s889_s3 = inlined_call_operand.vmem [shape: f32[8,32], index: 3, kind: input, shape index: {}]   ;;  %s890_s4 = inlined_call_operand.vmem [shape: f32[1,32], index: 4, kind: input, shape index: {}]   ;;  %s891_s5 = inlined_call_operand.hbm [shape: f32[2,32,256], index: 5, kind: output, shape index: {}]  }
   0x1   :  { %12 = vsyncpa [#allocation3 + $0x1], 0 }
   0x2   :  { %13 = vsyncpa [#allocation4], 0 }
   0x3   :  { %15 = vsyncpa [#allocation4 + $0x1], 0  ;;  %s702_s18 = smov 0   ;;  %s704_s19 = smov 0  }
   0x4   :  { %s706_s20 = smov 0   ;;  %s708_s21 = smov 0  }
   0x5 LB: > { %s723_s22 = sadd.s32 4294967295, %s666_s21   ;;  %s492_s23 = sadd.s32 4294967294, %s666_s21   ;;  %s666_s21 = sphi %s708_s21, %s901_s21   ;;  %s662_s20 = sphi %s706_s20, %s900_s20   ;;  %s658_s19 = sphi %s704_s19, %s899_s19   ;;  %s654_s18 = sphi %s702_s18, %s898_s18  }
   0x6   : > { %s727_s24 = sadd.s32 1, %s666_s21   ;;  %s28_s25 = sadd.s32 1, %s662_s20 }
   0x7   : > { %s25_s26 = ssub.s32 %s666_s21, %s727_s24  ;;  %p35_p0 = scmp.ne.s32.totalorder %s662_s20, %s658_s19 }
   0x8   : > { %p26_p1 = scmp.eq.s32.totalorder %s25_s26, 0  ;;  %p36_p2 = scmp.eq.s32.totalorder %s666_s21, 0 }
   0x9   : > { %p41_p3 = scmp.ne.s32.totalorder %s658_s19, %s654_s18  ;;  %p42_p4 = scmp.eq.s32.totalorder %s723_s22, 0 }
   0xa   : > { %s739_s27 = scalar_select %p26_p1, %s662_s20, %s28_s25  }
   0xb   : > { %p741_p5 = por %p36_p2, %p35_p0  ;;  %p745_p6 = por %p42_p4, %p41_p3 }
   0xc   : > { %p149_p7 = scmp.eq.s32.totalorder %s723_s22, 1  ;;  %p155_p8 = scmp.eq.s32.totalorder %s492_s23, 1 }
   0xd   : > { %p523_p10 = scmp.lt.s32.totalorder %s666_s21, 2  ;;  %s187_s7 = sand.u32 1, %s662_s20  }
   0xe   : > { %p752_p11 = por %p149_p7, %p35_p0  ;;  %p756_p12 = por %p155_p8, %p41_p3 }
   0xf   : > { %s509_s8 = sshll.u32 %s666_s21, 6  ;;  %s495_s9 = sshll.u32 %s187_s7, 6 }
  0x10   : > { %s196_s12 = scalar_lea.hbm %s886_s0, %s509_s8  ;;  %s191_s14 = scalar_lea.vmem [#allocation2], %s495_s9 }
  0x11   : > { %s197_s13 = sshll.u32 %s196_s12, 4  ;;  %s199_s15 = sshll.u32 %s191_s14, 4  ;;  %s198_s13 = int_to_ptr.hbm [resolvable:$true] %s197_s13  ;;  %s200_s15 = int_to_ptr.vmem [resolvable:$true] %s199_s15 }
  0x12   : > { %p767_p13 = pnand %p523_p10, %p741_p5  ;;  %p498_p0 = scmp.ge.s32.totalorder %s666_s21, 1 }
  0x13   : > { %p207_p1 = scmp.lt.s32.totalorder %s666_s21, 3  ;;  %s188_s17 = scalar_lea.sflag [#allocation3], %s187_s7 }
  0x14   : > { %s570_s23 = sshra.s32 %s198_s13, 4  ;;  %p574_p3 = pneg %p767_p13  ;;  %s571_s23 = int_to_ptr.hbm [resolvable:$true] %s570_s23 }
  0x15   : > { %s572_s25 = scalar_lea.hbm %s571_s23, 64  ;;  %s577_s28 = scalar_lea.hbm %s886_s0, 128 }
  0x16   : > { %p573_p2 = scmp.ne.s32.totalorder %s571_s23, %s572_s25  ;;  %p578_p5 = scmp.lt.s32.totalorder %s571_s23, %s886_s0 }
  0x17   : > { %p579_p8 = scmp.lt.s32.totalorder %s577_s28, %s572_s25 }
  0x18   : > { %p575_p4 = pnand %p574_p3, %p573_p2 }
  0x19   : > { %p580_p10 = por %p579_p8, %p578_p5 }
  0x1a   : > { %p576_p7 = pneg %p575_p4 }
  0x1c   : > { %p581_p9 = pnand %p580_p10, %p576_p7 }
  0x1e   : > { %584 = shalt.err (!%p581_p9)
}
  0x1f   : > { %s668_s7 = smov 256   ;;  %s669_s11 = smov 16  }
  0x20   : > { %518 = dma.hbm_to_vmem [thread:$0]  (!%p767_p13), %s198_s13, 1024, %s200_s15, %s188_s17, %s668_s7, %s668_s7, %s669_s11  }
  0x21   : > { %p208_p2 = pnand %p498_p0, %p207_p1 }
  0x22   : > { %s788_s12 = sand.u32 (!%p208_p2), 1, %s658_s19  }
  0x23   : > { %211 = sbr.rel (%p208_p2) target bundleno = 587 (0x24b), region = 40  ;;  %s499_s14 = sshll.u32 (!%p208_p2), %s788_s12, 6 }
  0x24   : > { %s214_s23 = scalar_lea.sflag (!%p208_p2), [#allocation3], %s788_s12  ;;  %s217_s25 = scalar_lea.vmem (!%p208_p2), [#allocation2], %s499_s14 }
  0x28   : > { %645 = dma.done.wait (%p745_p6), %s214_s23, 1024  }
  0x29   : > { %647 = vsyncadd (%p745_p6), %s214_s23, 4294966272  ;;  %v798_v0 = vld [vmem:[%s217_s25] sm:$0xff]  ;;  %v800_v1 = vld [vmem:[%s217_s25 + $0x8] sm:$0xff]  ;;  %v278_v16 = vlaneseq  ;;  %vm283_vm0 = vcmask 130112   ;;  %vm287_vm1 = vcmask 195712   ;;  %vm291_vm2 = vcmask 261312  }
  0x2a   : > { %v802_v2 = vld [vmem:[%s217_s25 + $0x20] sm:$0xff]  ;;  %v253_v3 = vadd.f32 %v800_v1, %v798_v0  ;;  %v806_v4 = vld [vmem:[%s217_s25 + $0x28] sm:$0xff]  ;;  %v810_v6 = vld [vmem:[%s217_s25 + $0x10] sm:$0xff]  ;;  %vm293_vm3 = vcmask 261120   ;;  %vm319_vm4 = vcmask 64512   ;;  %s244_s29 = scalar_lea.vmem [#allocation5], %s499_s14 }
  0x2b   : > { %v259_v5 = vadd.f32 %v806_v4, %v802_v2  ;;  %v812_v7 = vld [vmem:[%s217_s25 + $0x18] sm:$0xff]  ;;  %v814_v8 = vld [vmem:[%s217_s25 + $0x30] sm:$0xff]  ;;  %v270_v14 = vld [vmem:[%s887_s1 + $0x8] sm:$0xff]  ;;  %v279_v19 = vand.u32 127, %v278_v16  ;;  %v364_v41 = vshrl.u32 %v278_v16, 7  ;;  %s510_s13 = sshll.u32 %s723_s22, 6 }
  0x2c   : > { %254 = vadd.xlane.f32.xlu0 %v253_v3  ;;  %v816_v9 = vld [vmem:[%s217_s25 + $0x38] sm:$0xff]  ;;  %v256_v10 = vadd.f32 %v812_v7, %v810_v6  ;;  %v271_v13 = vld [vmem:[%s887_s1 + $0x10] sm:$0xff]  ;;  %v269_v15 = vld [vmem:[%s887_s1] sm:$0xff]  ;;  %s415_s17 = scalar_lea.hbm %s891_s5, %s510_s13  ;;  %s416_s26 = sshll.u32 %s244_s29, 4  ;;  %s417_s26 = int_to_ptr.vmem [resolvable:$true] %s416_s26 }
  0x2d   : > { %260 = vadd.xlane.f32.xlu1 %v259_v5  ;;  %v262_v11 = vadd.f32 %v816_v9, %v814_v8  ;;  %v272_v12 = vld [vmem:[%s887_s1 + $0x18] sm:$0xff]  ;;  %v281_v21 = vadd.s32 4294967288, %v279_v19  ;;  %v285_v22 = vadd.s32 4294967280, %v279_v19  ;;  %v289_v25 = vadd.s32 4294967272, %v279_v19  ;;  %v317_v36 = vld [vmem:[%s889_s3] sm:$0xff]  ;;  %561 = vset.pattern.permute.xlu2 %v364_v41  ;;  %s418_s8 = sshll.u32 %s415_s17, 4  ;;  %s419_s8 = int_to_ptr.hbm [resolvable:$true] %s418_s8 }
  0x2e   : > { %308 = vmatpush.msra.mxu0 %v272_v12  ;;  %338 = vmatpush.msra.mxu1 %v317_v36  ;;  %v273_v37 = vld [vmem:[%s888_s2] sm:$0x1]  ;;  %v383_v42 = vadd.s32 24, %v364_v41  ;;  %v377_v43 = vadd.s32 16, %v364_v41  ;;  %v371_v61 = vadd.s32 8, %v364_v41  ;;  %s404_s22 = scalar_lea.sflag [#allocation4], %s788_s12 }
  0x2f   : > { %v318_v44 = vld [vmem:[%s890_s4] sm:$0x1]  ;;  %s614_s14 = sshra.s32 %s419_s8, 4  ;;  %s620_s7 = scalar_lea.hbm %s891_s5, 128  ;;  %s615_s14 = int_to_ptr.hbm [resolvable:$true] %s614_s14 }
  0x30   : > { %309 = vmatpush.msra.mxu0 %v271_v13  ;;  %564 = vset.pattern.permute.xlu1 %v383_v42  ;;  %s616_s28 = scalar_lea.hbm %s615_s14, 64  ;;  %p621_p0 = scmp.lt.s32.totalorder %s615_s14, %s891_s5 }
  0x31   : > { %563 = vset.pattern.permute.xlu0 %v377_v43  ;;  %p617_p6 = scmp.ne.s32.totalorder %s615_s14, %s616_s28  ;;  %p622_p1 = scmp.lt.s32.totalorder %s620_s7, %s616_s28 }
  0x32   : > { %310 = vmatpush.msra.mxu0 %v270_v14 }
  0x33   : > { %p618_p9 = pnand %p617_p6, %p752_p11  ;;  %p623_p3 = por %p622_p1, %p621_p0 }
  0x34   : > { %257 = vadd.xlane.f32.xlu0 %v256_v10  ;;  %311 = vmatpush.msra.mxu0 %v269_v15 }
  0x35   : > { %263 = vadd.xlane.f32.xlu1 %v262_v11  ;;  %p619_p13 = pneg %p618_p9 }
  0x37   : > { %p624_p4 = pnand %p623_p3, %p619_p13 }
  0x9f   : > { %v255_v17 = vpop.xlane.xlu0 %254 }
  0xa0   : > { %v261_v18 = vpop.xlane.xlu1 %260  ;;  %v265_v20 = vmul.f32 0.00390625, %v255_v17 }
  0xa1   : > { %v267_v23 = vmul.f32 0.00390625, %v261_v18 }
  0xa2   : > { %v280_v29 = vperm.slane %v265_v20, %v279_v19 }
  0xa3   : > { %v286_v31 = vperm.slane %v267_v23, %v285_v22 }
  0xa7   : > { %v258_v24 = vpop.xlane.xlu0 %257 }
  0xa8   : > { %v266_v26 = vmul.f32 0.00390625, %v258_v24  ;;  %v264_v27 = vpop.xlane.xlu1 %263 }
  0xa9   : > { %v268_v28 = vmul.f32 0.00390625, %v264_v27 }
  0xaa   : > { %v282_v30 = vperm.slane %v266_v26, %v281_v21 }
  0xab   : > { %v290_v32 = vperm.slane %v268_v28, %v289_v25 }
  0xac   : > { %v284_v33 = vsel %vm283_vm0, %v282_v30, %v280_v29 }
  0xad   : > { %v288_v34 = vsel %vm287_vm1, %v286_v31, %v284_v33 }
  0xae   : > { %v292_v35 = vsel %vm291_vm2, %v290_v32, %v288_v34 }
  0xaf   : > { %501 = vmatmul.msk.f32.vlgmr.msra.gmra.mxu0 %vm293_vm3, %v292_v35 }
 0x12c   : > { %v313_v38 = vpop.f32.mrf.mxu0 }
 0x12d   : > { %v314_v39 = vadd.f32 %v313_v38, %v273_v37 }
 0x12f   : > { %v316_v40 = vmax.f32 %v314_v39, 0.0 }
 0x131   : > { %502 = vmatmul.msk.f32.vlgmr.msra.gmra.mxu1 %vm319_vm4, %v316_v40 }
 0x1ae   : > { %v340_v45 = vpop.f32.mrf.mxu1 }
 0x1af   : > { %v341_v46 = vadd.f32 %v340_v45, %v318_v44 }
 0x1b1   : > { %v503_v47 = vmul.f32 -1.442695, %v341_v46 }
 0x1b3   : > { %566 = vpow2.f32 %v503_v47 }
 0x1b9   : > { %v567_v48 = vpop.eup %566 }
 0x1ba   : > { %v346_v49 = vadd.f32 1.0, %v567_v48 }
 0x1bc   : > { %568 = vrcp.f32 %v346_v49  ;;  %v358_v53 = vand.u32 2147483648, %v346_v49  ;;  %v356_v55 = vand.u32 2147483647, %v346_v49  ;;  %vm352_vm6 = vweird.f32 %v346_v49 }
 0x1be   : > { %v359_v57 = vor.u32 1.1754944e-38, %v358_v53  ;;  %vm357_vm8 = vcmp.eq.f32.partialorder %v356_v55, 8.507059e+37 }
 0x1c2   : > { %v569_v50 = vpop.eup %568 }
 0x1c3   : > { %v348_v51 = vmul.f32 %v569_v50, %v346_v49  ;;  %vm353_vm5 = vweird.f32 %v569_v50 }
 0x1c4   : > { %vm354_vm7 = vmor %vm352_vm6, %vm353_vm5 }
 0x1c5   : > { %v349_v52 = vsub.f32 1.0, %v348_v51 }
 0x1c7   : > { %v350_v54 = vmul.f32 %v569_v50, %v349_v52 }
 0x1c9   : > { %v351_v56 = vadd.f32 %v569_v50, %v350_v54 }
 0x1cb   : > { %v355_v58 = vsel %vm354_vm7, %v569_v50, %v351_v56 }
 0x1cc   : > { %v360_v59 = vsel %vm357_vm8, %v359_v57, %v355_v58 }
 0x1cd   : > { %v362_v60 = vperm.slane %v360_v59, 0 }
 0x1cf   : > { %385 = vperm.xlu1 %564, %v362_v60   ;;  %379 = vperm.xlu0 %563, %v362_v60  }
 0x1d0   : > { %367 = vperm.xlu2 %561, %v362_v60  }
 0x1d7   : > { %565 = vset.pattern.permute.xlu0 %v383_v42 }
 0x1d8   : > { %562 = vset.pattern.permute.xlu2 %v371_v61 }
 0x1e0   : > { %373 = vperm.xlu2 %562, %v362_v60  }
 0x22a   : > { %v368_v62 = vpop.permute.xlu2 %367 }
 0x22b   : > { %v387_v63 = vmul.f32 %v368_v62, %v798_v0  ;;  %v388_v3 = vmul.f32 %v368_v62, %v800_v1 }
 0x22d   : > { %395 = vst [vmem:[%s244_s29] sm:$0xff] %v387_v63 }
 0x22e   : > { %396 = vst [vmem:[%s244_s29 + $0x8] sm:$0xff] %v388_v3 }
 0x23a   : > { %v374_v5 = vpop.permute.xlu2 %373 }
 0x23b   : > { %v389_v10 = vmul.f32 %v374_v5, %v810_v6  ;;  %v390_v11 = vmul.f32 %v374_v5, %v812_v7 }
 0x23d   : > { %397 = vst [vmem:[%s244_s29 + $0x10] sm:$0xff] %v389_v10 }
 0x23e   : > { %398 = vst [vmem:[%s244_s29 + $0x18] sm:$0xff] %v390_v11 }
 0x241   : > { %v386_v0 = vpop.permute.xlu1 %385  ;;  %v380_v1 = vpop.permute.xlu0 %379 }
 0x242   : > { %v393_v12 = vmul.f32 %v386_v0, %v814_v8  ;;  %v394_v13 = vmul.f32 %v386_v0, %v816_v9  ;;  %v391_v6 = vmul.f32 %v380_v1, %v802_v2  ;;  %v392_v7 = vmul.f32 %v380_v1, %v806_v4 }
 0x244   : > { %401 = vst [vmem:[%s244_s29 + $0x30] sm:$0xff] %v393_v12 }
 0x245   : > { %402 = vst [vmem:[%s244_s29 + $0x38] sm:$0xff] %v394_v13 }
 0x246   : > { %399 = vst [vmem:[%s244_s29 + $0x20] sm:$0xff] %v391_v6 }
 0x247   : > { %400 = vst [vmem:[%s244_s29 + $0x28] sm:$0xff] %v392_v7 }
 0x248   : > { %627 = shalt.err (!%p624_p4)
}
 0x249   : > { %s670_s12 = smov 256   ;;  %s671_s25 = smov 16  }
 0x24a   : > { %513 = dma.vmem_to_hbm [thread:$0]  (%p752_p11), %s417_s26, 1024, %s419_s8, %s404_s22, %s670_s12, %s670_s12, %s671_s25  }
 0x24b PF: > { %s433_s29 = sand.u32 1, %s654_s18   ;;  %p897_p7 = scmp.ge.s32.totalorder %s666_s21, 2 }
 0x24c   : > { %s434_s13 = scalar_lea.sflag [#allocation4], %s433_s29 }
 0x24d   : > { %p520_p5 = pnand %p897_p7, %p756_p12 }
 0x24f   : > { %p521_p8 = pneg %p520_p5 }
 0x251   : > { %649 = dma.done.wait (%p521_p8), %s434_s13, 1024  }
 0x252   : > { %651 = vsyncadd (%p521_p8), %s434_s13, 4294966272  ;;  %p18_p10 = scmp.ge.s32.totalorder %s727_s24, 4   ;;  %s898_s18 = smov %s658_s19 }
 0x253   : > { %s899_s19 = smov %s662_s20  ;;  %s900_s20 = smov %s739_s27 }
 0x254   : > { %s901_s21 = smov %s727_s24  ;;  %20 = sbr.rel (!%p18_p10) target bundleno = 5 (0x5), region = 85 }
 0x259   :  { %440 = vsyncpa [#allocation3], 1 }
 0x25a   :  { %442 = vsyncpa [#allocation3 + $0x1], 1 }
 0x25b   :  { %443 = vsyncpa [#allocation4], 1 }
 0x25c   :  { %445 = vsyncpa [#allocation4 + $0x1], 1 }

</bundles_post_ra>
